<compile_context>
chip_gen: v5e
topology: v5e:2x2
jax: 0.10.0
libtpu: 0.0.40
codegen_flags: <defaults>
</compile_context>

<pallas_src>
import functools

import numpy as np

import jax
import jax.numpy as jnp
from jax.experimental import pallas as pl
from jax.experimental.pallas import tpu as pltpu


_CompilerParams = getattr(pltpu, "CompilerParams", None) or getattr(
    pltpu, "TPUCompilerParams")


# --------------------------------------------------------------------------- #
# Kernel
# --------------------------------------------------------------------------- #
def spectral_conv1d_kernel(x_ref, basis_ref, g_ref, o_ref, *, cin, n):
    """x_ref: (tm, Cin*N) bf16; basis_ref: (N, 2K) bf16;
    g_ref: (Cin, 2K, Cout*N) bf16; o_ref: (tm, Cout*N) f32.

    Per input channel: one MXU dot against the shared truncated-DFT basis and
    one MXU dot against that channel's folded (mixing + irfft) operator, with
    f32 accumulation.  Total flops equal the dense ideal (no zero padding)."""
    basis = basis_ref[...]                                        # (N, 2K)
    acc = jnp.zeros((x_ref.shape[0], o_ref.shape[-1]), jnp.float32)
    for i in range(cin):                                          # small, unrolled
        xi = x_ref[:, i * n:(i + 1) * n]                          # (tm, N) bf16
        fi = jnp.dot(xi, basis, preferred_element_type=jnp.float32)   # (tm, 2K)
        acc = acc + jnp.dot(fi.astype(jnp.bfloat16), g_ref[i],
                            preferred_element_type=jnp.float32)
    o_ref[...] = acc.astype(o_ref.dtype)


# --------------------------------------------------------------------------- #
# Capability probes / sizing helpers (plain Python, run outside jit)
# --------------------------------------------------------------------------- #
def _copy_kernel(x_ref, o_ref):
    o_ref[...] = x_ref[...]


@functools.lru_cache(maxsize=1)
def _single_buffer_supported():
    """Probe (compile + run a tiny kernel) whether pl.Buffered(1) single-
    buffering of grid-invariant operands works on this jax/libtpu combo."""
    if not hasattr(pl, "Buffered"):
        return False
    try:
        fn = pl.pallas_call(
            _copy_kernel,
            out_shape=jax.ShapeDtypeStruct((8, 128), jnp.float32),
            grid=(2,),
            in_specs=[pl.BlockSpec((8, 128), lambda i: (0, 0),
                                   pipeline_mode=pl.Buffered(1))],
            out_specs=pl.BlockSpec((8, 128), lambda i: (0, 0)),
        )
        jax.block_until_ready(fn(jnp.zeros((8, 128), jnp.float32)))
        return True
    except Exception:
        return False


def _tpu_budget():
    """(per-TensorCore VMEM bytes, TensorCore count) with conservative
    fallbacks (64 MiB = v7x per-core VMEM, the smallest of v5e/v6e/v7x)."""
    vmem_bytes, num_cores = 64 << 20, 1
    try:
        info = pltpu.get_tpu_info()
        v = int(getattr(info, "vmem_capacity_bytes", 0) or 0)
        if v > 0:
            vmem_bytes = v
        for attr in ("num_tensorcores", "tensorcores_per_chip", "num_cores",
                     "core_count"):
            c = getattr(info, attr, None)
            if c:
                num_cores = int(c)
                break
    except Exception:
        pass
    return vmem_bytes, max(1, num_cores)


def _vmem_model(cin, cout, n, modes, single_buffer):
    """(resident operand bytes, bytes per tile row) for the kernel above."""
    two_k = 2 * modes
    buf = 1 if single_buffer else 2
    resident = buf * 2 * (n * two_k + cin * two_k * cout * n)   # bf16 basis + G
    per_row = (2 * cin * n * 2       # double-buffered bf16 x-tile row
               + 2 * cout * n * 4    # double-buffered f32 out-tile row
               + cout * n * 4        # f32 accumulator temp
               + two_k * 4)          # f32 per-channel F temp
    return resident, per_row


def _pick_tile_rows(m_rows, resident, per_row, vmem_bytes, num_cores):
    """Row-tile size: multiple of 8, VMEM-budgeted (basis/G residency and
    double-buffering included), aiming for >=4 grid steps of 256..1024 rows
    when M allows; never shrink below 256 rows just to create more steps."""
    budget = int(0.7 * vmem_bytes) - resident
    cap = max(8, (budget // max(per_row, 1)) // 8 * 8)
    tm = min(1024, cap, ((m_rows + 7) // 8) * 8)
    tm = max(8, (tm // 8) * 8)
    target_steps = max(4, 2 * num_cores)
    if m_rows // target_steps >= 256:
        tm = min(tm, max(256, ((pl.cdiv(m_rows, target_steps) + 7) // 8) * 8))
    return tm


# --------------------------------------------------------------------------- #
# Forward pass
# --------------------------------------------------------------------------- #
@functools.partial(jax.jit, static_argnames=("modes", "tm", "single_buffer",
                                             "vmem_limit_bytes"))
def _spectral_conv1d_impl(x, weights_real, weights_imag, *, modes, tm,
                          single_buffer, vmem_limit_bytes):
    B, H, cin, N = x.shape
    _, cout, _ = weights_real.shape
    two_k = 2 * modes
    M = B * H

    # ---- shape-only DFT factors: host (numpy) constants ---------------------
    n_idx = np.arange(N, dtype=np.float64)
    k_idx = np.arange(modes, dtype=np.float64)
    ang_f = 2.0 * np.pi * np.outer(n_idx, k_idx) / N              # (N, K)
    basis = jnp.asarray(
        np.concatenate([np.cos(ang_f), -np.sin(ang_f)], axis=1),  # [Re | Im]
        dtype=jnp.bfloat16)                                       # (N, 2K)

    wk = np.where(k_idx == 0, 1.0, 2.0) / N                       # irfft weights
    ang_b = 2.0 * np.pi * np.outer(k_idx, n_idx) / N              # (K, N)
    cb = jnp.asarray(np.cos(ang_b) * wk[:, None], dtype=jnp.float32)
    sb = jnp.asarray(np.sin(ang_b) * wk[:, None], dtype=jnp.float32)

    # ---- weight-dependent operator: complex mixing folded with irfft --------
    wr = weights_real.astype(jnp.float32)
    wi = weights_imag.astype(jnp.float32)
    g_re = (jnp.einsum("iok,kn->ikon", wr, cb)
            - jnp.einsum("iok,kn->ikon", wi, sb))                 # (Cin,K,Cout,N)
    g_im = -(jnp.einsum("iok,kn->ikon", wi, cb)
             + jnp.einsum("iok,kn->ikon", wr, sb))
    g = jnp.concatenate([g_re, g_im], axis=1).reshape(
        cin, two_k, cout * N).astype(jnp.bfloat16)                # (Cin,2K,Cout*N)

    # ---- lane-dense 2-D slab, bf16 on the wire, no full-array padding -------
    xm = x.reshape(M, cin * N).astype(jnp.bfloat16)
    num_blocks = pl.cdiv(M, tm)   # tail block handled by Pallas OOB masking

    def _const_spec(shape):
        if single_buffer:
            return pl.BlockSpec(shape, lambda i: (0,) * len(shape),
                                pipeline_mode=pl.Buffered(1))
        return pl.BlockSpec(shape, lambda i: (0,) * len(shape))

    out = pl.pallas_call(
        functools.partial(spectral_conv1d_kernel, cin=cin, n=N),
        out_shape=jax.ShapeDtypeStruct((M, cout * N), jnp.float32),
        grid=(num_blocks,),
        in_specs=[
            pl.BlockSpec((tm, cin * N), lambda i: (i, 0)),
            _const_spec((N, two_k)),
            _const_spec((cin, two_k, cout * N)),
        ],
        out_specs=pl.BlockSpec((tm, cout * N), lambda i: (i, 0)),
        compiler_params=_CompilerParams(
            dimension_semantics=("parallel",),
            vmem_limit_bytes=vmem_limit_bytes),
    )(xm, basis, g)

    return out.reshape(B, H, cout, N)


def spectral_conv1d(x, weights_real, weights_imag, *, modes):
    """x: (B, H, Cin, N) float -> (B, H, Cout, N) float32,
    matching SpectralConv1d.forward (rfft -> complex mixing -> irfft)."""
    B, H, cin, N = x.shape
    cin_w, cout, k_modes = weights_real.shape
    assert cin_w == cin and k_modes == modes
    # Nyquist bin (k == N//2) would need irfft weight 1/N instead of 2/N.
    assert 1 <= modes <= N // 2, "modes must not include the Nyquist bin"

    M = B * H
    single_buffer = _single_buffer_supported()
    vmem_bytes, num_cores = _tpu_budget()
    resident, per_row = _vmem_model(cin, cout, N, modes, single_buffer)
    tm = _pick_tile_rows(M, resident, per_row, vmem_bytes, num_cores)

    need = resident + tm * per_row + (4 << 20)        # + pipeline/layout slack
    cap = max(int(0.92 * vmem_bytes), need)           # never cap below need
    vmem_limit = int(min(max(need, 32 << 20), cap))

    return _spectral_conv1d_impl(
        x, weights_real, weights_imag, modes=modes, tm=tm,
        single_buffer=single_buffer, vmem_limit_bytes=vmem_limit)


# --------------------------------------------------------------------------- #
# Reference + demo
# --------------------------------------------------------------------------- #
def reference_spectral_conv1d(x, wr, wi, modes):
    """Pure-JAX f32 reference mirroring the PyTorch forward."""
    B, H, _, N = x.shape
    cout = wr.shape[1]
    x_ft = jnp.fft.rfft(x, axis=-1)
    a = x_ft[..., :modes]
    out_re = (jnp.einsum("bjix,iox->bjox", a.real, wr)
              - jnp.einsum("bjix,iox->bjox", a.imag, wi))
    out_im = (jnp.einsum("bjix,iox->bjox", a.real, wi)
              + jnp.einsum("bjix,iox->bjox", a.imag, wr))
    out_ft = jnp.zeros((B, H, cout, N // 2 + 1), dtype=jnp.complex64)
    out_ft = out_ft.at[..., :modes].set(out_re + 1j * out_im)
    return jnp.fft.irfft(out_ft, n=N, axis=-1)


if __name__ == "__main__":
    # Small shapes consistent with the module: x is (B, H, in_channels, seq_len)
    B, H, in_channels, seq_len = 2, 4, 4, 16
    out_channels = 4
    modes = min(32, seq_len // 2)   # = 8

    key = jax.random.PRNGKey(0)
    kx, kr, ki = jax.random.split(key, 3)

    x = jax.random.normal(kx, (B, H, in_channels, seq_len), dtype=jnp.float32)

    # Deterministic parameter init matching __init__: scale * U[0, 1)
    scale = 1.0 / (in_channels * out_channels)
    weights_real = scale * jax.random.uniform(
        kr, (in_channels, out_channels, modes), dtype=jnp.float32)
    weights_imag = scale * jax.random.uniform(
        ki, (in_channels, out_channels, modes), dtype=jnp.float32)

    y = spectral_conv1d(x, weights_real, weights_imag, modes=modes)
    y = jax.block_until_ready(y)

    y_ref = reference_spectral_conv1d(x, weights_real, weights_imag, modes)
    assert y.shape == (B, H, out_channels, seq_len)

    max_err = float(jnp.max(jnp.abs(y - y_ref)))
    rel_err = float(jnp.linalg.norm(y - y_ref)
                    / (jnp.linalg.norm(y_ref) + 1e-12))
    # bf16 MXU operands with f32 accumulation: expect ~1e-3 abs / ~1% relative.
    assert max_err < 3e-2 and rel_err < 3e-2, (max_err, rel_err)

    print("KERNEL_OK")
</pallas_src>

<mosaic_0001>
module attributes {stable_mosaic.version = 11 : i64} {
  func.func @_copy_kernel(%arg0: i32, %arg1: memref<8x128xf32, #tpu.memory_space<vmem>>, %arg2: memref<8x128xf32, #tpu.memory_space<vmem>>) attributes {dimension_semantics = [#tpu.dimension_semantics<arbitrary>], iteration_bounds = array<i64: 2>, scalar_prefetch = 0 : i64, scratch_operands = 0 : i64, tpu.core_type = #tpu.core_type<tc>, window_params = [{pipeline_mode = #tpu.pipeline_mode<synchronous>, transform_indices = @transform_0, window_bounds = array<i64: 8, 128>}, {pipeline_mode = #tpu.pipeline_mode<synchronous>, transform_indices = @transform_1, window_bounds = array<i64: 8, 128>}]} {
    %c0 = arith.constant 0 : index
    %c0_0 = arith.constant 0 : index
    %0 = vector.load %arg1[%c0, %c0_0] : memref<8x128xf32, #tpu.memory_space<vmem>>, vector<8x128xf32>
    %c0_1 = arith.constant 0 : index
    %c0_2 = arith.constant 0 : index
    %1 = vector.load %arg2[%c0_1, %c0_2] : memref<8x128xf32, #tpu.memory_space<vmem>>, vector<8x128xf32>
    tpu.vector_store %arg2[%c0_1, %c0_2], %0 {strides = array<i32>} : memref<8x128xf32, #tpu.memory_space<vmem>>, vector<8x128xf32>,
    return
  }
  func.func @transform_0(%arg0: i32) -> (i32, i32) {
    %c0_i32 = arith.constant 0 : i32
    %c0_i32_0 = arith.constant 0 : i32
    %c0_i32_1 = arith.constant 0 : i32
    return %c0_i32, %c0_i32_0 : i32, i32
  }
  func.func @transform_1(%arg0: i32) -> (i32, i32) {
    %c0_i32 = arith.constant 0 : i32
    %c0_i32_0 = arith.constant 0 : i32
    %c0_i32_1 = arith.constant 0 : i32
    return %c0_i32, %c0_i32_0 : i32, i32
  }
}

module attributes {stable_mosaic.version = 11 : i64} {
  func.func @spectral_conv1d_kernel(%arg0: i32, %arg1: memref<8x64xbf16, #tpu.memory_space<vmem>>, %arg2: memref<16x16xbf16, #tpu.memory_space<vmem>>, %arg3: memref<4x16x64xbf16, #tpu.memory_space<vmem>>, %arg4: memref<8x64xf32, #tpu.memory_space<vmem>>) attributes {dimension_semantics = [#tpu.dimension_semantics<parallel>], iteration_bounds = array<i64: 1>, scalar_prefetch = 0 : i64, scratch_operands = 0 : i64, tpu.core_type = #tpu.core_type<tc>, window_params = [{transform_indices = @transform_0, window_bounds = array<i64: 8, 64>}, {pipeline_mode = #tpu.pipeline_mode<synchronous>, transform_indices = @transform_1, window_bounds = array<i64: 16, 16>}, {pipeline_mode = #tpu.pipeline_mode<synchronous>, transform_indices = @transform_2, window_bounds = array<i64: 4, 16, 64>}, {transform_indices = @transform_3, window_bounds = array<i64: 8, 64>}]} {
    %c0 = arith.constant 0 : index
    %c0_0 = arith.constant 0 : index
    %0 = vector.load %arg2[%c0, %c0_0] : memref<16x16xbf16, #tpu.memory_space<vmem>>, vector<16x16xbf16>
    %cst = arith.constant 0.000000e+00 : f32
    %1 = vector.broadcast %cst : f32 to vector<8x64xf32>
    %c0_1 = arith.constant 0 : index
    %c0_2 = arith.constant 0 : index
    %2 = vector.load %arg1[%c0_1, %c0_2] : memref<8x64xbf16, #tpu.memory_space<vmem>>, vector<8x16xbf16>
    %cst_3 = arith.constant dense<0.000000e+00> : vector<8x16xf32>
    %3 = tpu.matmul %2, %0, %cst_3 {dimension_numbers = #tpu.dot_dimension_numbers<[1], [0], [0], [1], [0, 0, 1, 1], [], []>} : vector<8x16xbf16>, vector<16x16xbf16>, vector<8x16xf32> -> vector<8x16xf32>
    %4 = arith.truncf %3 : vector<8x16xf32> to vector<8x16xbf16>
    %c0_4 = arith.constant 0 : index
    %c0_5 = arith.constant 0 : index
    %c0_6 = arith.constant 0 : index
    %5 = vector.load %arg3[%c0_4, %c0_5, %c0_6] : memref<4x16x64xbf16, #tpu.memory_space<vmem>>, vector<1x16x64xbf16>
    %6 = vector.shape_cast %5 : vector<1x16x64xbf16> to vector<16x64xbf16>
    %cst_7 = arith.constant dense<0.000000e+00> : vector<8x64xf32>
    %7 = tpu.matmul %4, %6, %cst_7 {dimension_numbers = #tpu.dot_dimension_numbers<[1], [0], [0], [1], [0, 0, 1, 1], [], []>} : vector<8x16xbf16>, vector<16x64xbf16>, vector<8x64xf32> -> vector<8x64xf32>
    %8 = arith.addf %1, %7 : vector<8x64xf32>
    %c0_8 = arith.constant 0 : index
    %c16 = arith.constant 16 : index
    %9 = vector.load %arg1[%c0_8, %c16] : memref<8x64xbf16, #tpu.memory_space<vmem>>, vector<8x16xbf16>
    %cst_9 = arith.constant dense<0.000000e+00> : vector<8x16xf32>
    %10 = tpu.matmul %9, %0, %cst_9 {dimension_numbers = #tpu.dot_dimension_numbers<[1], [0], [0], [1], [0, 0, 1, 1], [], []>} : vector<8x16xbf16>, vector<16x16xbf16>, vector<8x16xf32> -> vector<8x16xf32>
    %11 = arith.truncf %10 : vector<8x16xf32> to vector<8x16xbf16>
    %c1 = arith.constant 1 : index
    %c0_10 = arith.constant 0 : index
    %c0_11 = arith.constant 0 : index
    %12 = vector.load %arg3[%c1, %c0_10, %c0_11] : memref<4x16x64xbf16, #tpu.memory_space<vmem>>, vector<1x16x64xbf16>
    %13 = vector.shape_cast %12 : vector<1x16x64xbf16> to vector<16x64xbf16>
    %cst_12 = arith.constant dense<0.000000e+00> : vector<8x64xf32>
    %14 = tpu.matmul %11, %13, %cst_12 {dimension_numbers = #tpu.dot_dimension_numbers<[1], [0], [0], [1], [0, 0, 1, 1], [], []>} : vector<8x16xbf16>, vector<16x64xbf16>, vector<8x64xf32> -> vector<8x64xf32>
    %15 = arith.addf %8, %14 : vector<8x64xf32>
    %c0_13 = arith.constant 0 : index
    %c32 = arith.constant 32 : index
    %16 = vector.load %arg1[%c0_13, %c32] : memref<8x64xbf16, #tpu.memory_space<vmem>>, vector<8x16xbf16>
    %cst_14 = arith.constant dense<0.000000e+00> : vector<8x16xf32>
    %17 = tpu.matmul %16, %0, %cst_14 {dimension_numbers = #tpu.dot_dimension_numbers<[1], [0], [0], [1], [0, 0, 1, 1], [], []>} : vector<8x16xbf16>, vector<16x16xbf16>, vector<8x16xf32> -> vector<8x16xf32>
    %18 = arith.truncf %17 : vector<8x16xf32> to vector<8x16xbf16>
    %c2 = arith.constant 2 : index
    %c0_15 = arith.constant 0 : index
    %c0_16 = arith.constant 0 : index
    %19 = vector.load %arg3[%c2, %c0_15, %c0_16] : memref<4x16x64xbf16, #tpu.memory_space<vmem>>, vector<1x16x64xbf16>
    %20 = vector.shape_cast %19 : vector<1x16x64xbf16> to vector<16x64xbf16>
    %cst_17 = arith.constant dense<0.000000e+00> : vector<8x64xf32>
    %21 = tpu.matmul %18, %20, %cst_17 {dimension_numbers = #tpu.dot_dimension_numbers<[1], [0], [0], [1], [0, 0, 1, 1], [], []>} : vector<8x16xbf16>, vector<16x64xbf16>, vector<8x64xf32> -> vector<8x64xf32>
    %22 = arith.addf %15, %21 : vector<8x64xf32>
    %c0_18 = arith.constant 0 : index
    %c48 = arith.constant 48 : index
    %23 = vector.load %arg1[%c0_18, %c48] : memref<8x64xbf16, #tpu.memory_space<vmem>>, vector<8x16xbf16>
    %cst_19 = arith.constant dense<0.000000e+00> : vector<8x16xf32>
    %24 = tpu.matmul %23, %0, %cst_19 {dimension_numbers = #tpu.dot_dimension_numbers<[1], [0], [0], [1], [0, 0, 1, 1], [], []>} : vector<8x16xbf16>, vector<16x16xbf16>, vector<8x16xf32> -> vector<8x16xf32>
    %25 = arith.truncf %24 : vector<8x16xf32> to vector<8x16xbf16>
    %c3 = arith.constant 3 : index
    %c0_20 = arith.constant 0 : index
    %c0_21 = arith.constant 0 : index
    %26 = vector.load %arg3[%c3, %c0_20, %c0_21] : memref<4x16x64xbf16, #tpu.memory_space<vmem>>, vector<1x16x64xbf16>
    %27 = vector.shape_cast %26 : vector<1x16x64xbf16> to vector<16x64xbf16>
    %cst_22 = arith.constant dense<0.000000e+00> : vector<8x64xf32>
    %28 = tpu.matmul %25, %27, %cst_22 {dimension_numbers = #tpu.dot_dimension_numbers<[1], [0], [0], [1], [0, 0, 1, 1], [], []>} : vector<8x16xbf16>, vector<16x64xbf16>, vector<8x64xf32> -> vector<8x64xf32>
    %29 = arith.addf %22, %28 : vector<8x64xf32>
    %c0_23 = arith.constant 0 : index
    %c0_24 = arith.constant 0 : index
    %30 = vector.load %arg4[%c0_23, %c0_24] : memref<8x64xf32, #tpu.memory_space<vmem>>, vector<8x64xf32>
    tpu.vector_store %arg4[%c0_23, %c0_24], %29 {strides = array<i32>} : memref<8x64xf32, #tpu.memory_space<vmem>>, vector<8x64xf32>,
    return
  }
  func.func @transform_0(%arg0: i32) -> (i32, i32) {
    %c0_i32 = arith.constant 0 : i32
    %c0_i32_0 = arith.constant 0 : i32
    return %arg0, %c0_i32 : i32, i32
  }
  func.func @transform_1(%arg0: i32) -> (i32, i32) {
    %c0_i32 = arith.constant 0 : i32
    %c0_i32_0 = arith.constant 0 : i32
    %c0_i32_1 = arith.constant 0 : i32
    return %c0_i32, %c0_i32_0 : i32, i32
  }
  func.func @transform_2(%arg0: i32) -> (i32, i32, i32) {
    %c0_i32 = arith.constant 0 : i32
    %c0_i32_0 = arith.constant 0 : i32
    %c0_i32_1 = arith.constant 0 : i32
    %c0_i32_2 = arith.constant 0 : i32
    return %c0_i32, %c0_i32_0, %c0_i32_1 : i32, i32, i32
  }
  func.func @transform_3(%arg0: i32) -> (i32, i32) {
    %c0_i32 = arith.constant 0 : i32
    %c0_i32_0 = arith.constant 0 : i32
    return %arg0, %c0_i32 : i32, i32
  }
}

</mosaic_0001>

<bundles_post_ra>
// kernel: tpu_custom_call.1
= control target key start
LH: loop header
LB: loop body
LE: loop exit
PB: predicated region body
PF: predicated region fallthrough
CT: control target
= control target key end

     0   :  { %6 = vsyncpa [#allocation3], 0  ;;  %s286_s0 = inlined_call_operand.hbm [shape: f32[8,128], index: 0, kind: input, shape index: {}]   ;;  %s287_s1 = inlined_call_operand.hbm [shape: f32[8,128], index: 1, kind: output, shape index: {}]  }
   0x1   :  { %7 = vsyncpa [#allocation4], 0  ;;  %s269_s6 = smov 0  }
   0x2 LB: > { %s148_s7 = sadd.s32 4294967295, %s255_s6   ;;  %p149_p0 = scmp.ge.s32.totalorder %s255_s6, 1  ;;  %s255_s6 = sphi %s269_s6, %s13_s6  }
   0x3   : > { %p60_p1 = scmp.lt.s32.totalorder %s255_s6, 3  ;;  %s72_s10 = sshll.u32 %s286_s0, 4  ;;  %s73_s10 = int_to_ptr.hbm [resolvable:$true] %s72_s10 }
   0x4   : > { %p169_p3 = scmp.eq.s32.totalorder %s148_s7, 0  ;;  %s257_s11 = smov [#allocation2]  }
   0x5   : > { %p61_p2 = pnand %p149_p0, %p60_p1  ;;  %s74_s12 = sshll.u32 %s257_s11, 4  ;;  %s75_s12 = int_to_ptr.vmem [resolvable:$true] %s74_s12 }
   0x7   : > { %p165_p4 = pneg %p61_p2  ;;  %87 = sbr.rel (%p61_p2) target bundleno = 19 (0x13), region = 24 }
   0x9   : > { %p166_p5 = pnand %p169_p3, %p165_p4 }
   0xb   : > { %168 = dma.hbm_to_vmem [thread:$0]  (!%p166_p5), %s73_s10, 128, %s75_s12, [#allocation3]  }
   0xc   : > { %246 = dma.done.wait (%p169_p3), [#allocation3], 128  }
   0xd   : > { %248 = vsyncadd (%p169_p3), [#allocation3], 4294967168  ;;  %s258_s13 = smov [#allocation5]   ;;  %s108_s17 = sshll.u32 %s287_s1, 4  ;;  %v98_v0 = vld [vmem:[#allocation2] sm:$0xff]  ;;  %s109_s17 = int_to_ptr.hbm [resolvable:$true] %s108_s17 }
   0xe   : > { %s106_s14 = sshll.u32 %s258_s13, 4  ;;  %p171_p6 = scmp.eq.s32.totalorder %s148_s7, 1  ;;  %99 = vst [vmem:[#allocation5] sm:$0xff] %v98_v0  ;;  %s107_s14 = int_to_ptr.vmem [resolvable:$true] %s106_s14 }
  0x10   : > { %162 = dma.vmem_to_hbm [thread:$0]  (%p171_p6), %s107_s14, 128, %s109_s17, [#allocation4]  }
  0x11   : > { %250 = dma.done.wait (%p171_p6), [#allocation4], 128  }
  0x12   : > { %252 = vsyncadd (%p171_p6), [#allocation4], 4294967168 }
  0x13 PF: > { %s13_s6 = sadd.s32 1, %s255_s6  }
  0x14   : > { %p10_p7 = scmp.ge.s32.totalorder %s13_s6, 4  }
  0x16   :  { %12 = sbr.rel (!%p10_p7) target bundleno = 2 (0x2), region = 53 }
  0x1b   :  { %122 = vsyncpa [#allocation3], 1 }
  0x1c   :  { %124 = vsyncpa [#allocation3 + $0x1], 1 }
  0x1d   :  { %125 = vsyncpa [#allocation4], 1 }
  0x1e   :  { %127 = vsyncpa [#allocation4 + $0x1], 1 }

// kernel: _spectral_conv1d_impl.1
= control target key start
LH: loop header
LB: loop body
LE: loop exit
PB: predicated region body
PF: predicated region fallthrough
CT: control target
= control target key end

     0   :  { %vm24_vm0 = vcmask 130048   ;;  %s251_s16 = smov 112   ;;  %s252_s17 = smov 96   ;;  %vm203_vm1 = vcmask 523264   ;;  %s303_s0 = inlined_call_operand.vmem [shape: bf16[8,64], index: 0, kind: input, shape index: {}]   ;;  %s304_s1 = inlined_call_operand.vmem [shape: bf16[16,16], index: 1, kind: input, shape index: {}]   ;;  %s305_s2 = inlined_call_operand.vmem [shape: bf16[4,16,64], index: 2, kind: input, shape index: {}]   ;;  %s306_s3 = inlined_call_operand.vmem [shape: f32[8,64], index: 3, kind: output, shape index: {}]  }
   0x1   :  { %v17_v0 = vld [vmem:[%s303_s0] sm:$0xf]  ;;  %s253_s18 = smov 80   ;;  %v245_v8 = vld [vmem:[%s305_s2 + $0x8] sm:$0xff]  ;;  %v246_v11 = vld [vmem:[%s305_s2 + $0x10] sm:$0xff] }
   0x2   :  { %v243_v1 = vld [vmem:[%s304_s1] sm:$0xff]  ;;  %v45_v2 = vunpack.c.l.b16 %v17_v0  ;;  %85 = vmatpush.bf16.msra.mxu2 %v245_v8  ;;  %v247_v20 = vld [vmem:[%s305_s2 + $0x18] sm:$0xff] }
   0x3   :  { %35 = vmatpush.bf16.msra.mxu0 %v243_v1  ;;  %59 = vmatpush.bf16.msra.mxu1 %v243_v1  ;;  %v244_v9 = vld [vmem:[%s305_s2] sm:$0xff] }
   0x4   :  { %v46_v3 = vpack.c.b16 %v45_v2, %v45_v2  ;;  %107 = vmatpush.bf16.msra.mxu3 %v244_v9 }
   0x6   :  { %47 = vrot.lane.b32.xlu0 %v46_v3, %s251_s16  ;;  %113 = vrot.lane.b32.xlu1 %v46_v3, %s252_s17 }
   0x7   :  { %125 = vmatpush.bf16.msrb.mxu0 %v243_v1  ;;  %170 = vmatpush.bf16.msrb.mxu2 %v243_v1 }
   0x8   :  { %213 = vmatmul.msk.bf16.vlgmr.msra.gmra.mxu0 %vm24_vm0, %v17_v0  ;;  %151 = vmatpush.bf16.msrb.mxu1 %v246_v11 }
   0x9   :  { %196 = vmatpush.bf16.msrb.mxu3 %v247_v20 }
   0xe   :  { %158 = vrot.lane.b32.xlu0 %v46_v3, %s253_s18 }
  0x78   :  { %v48_v4 = vpop.permute.xlu0 %47  ;;  %v114_v5 = vpop.permute.xlu1 %113 }
  0x79   :  { %214 = vmatmul.msk.bf16.vlgmr.msra.gmra.mxu1 %vm24_vm0, %v48_v4  ;;  %227 = vmatmul.msk.bf16.vlgmr.msrb.gmra.mxu0 %vm24_vm0, %v114_v5 }
  0x80   :  { %v159_v18 = vpop.permute.xlu0 %158 }
  0x85   :  { %v37_v6 = vpop.f32.mrf.mxu0 }
  0x86   :  { %v41_v10 = vpack.c.bf16 %v37_v6, %v37_v6 }
  0x88   :  { %226 = vmatmul.msk.bf16.vlgmr.msra.gmra.mxu3 %vm24_vm0, %v41_v10 }
  0x8d   :  { %v39_v7 = vpop.f32.mrf.mxu0 }
  0xf6   :  { %v61_v12 = vpop.f32.mrf.mxu1  ;;  %v127_v13 = vpop.f32.mrf.mxu0 }
  0xf7   :  { %v65_v14 = vpack.c.bf16 %v61_v12, %v61_v12  ;;  %v131_v15 = vpack.c.bf16 %v127_v13, %v127_v13 }
  0xf9   :  { %221 = vmatmul.msk.bf16.vlgmr.msra.gmra.mxu2 %vm24_vm0, %v65_v14  ;;  %234 = vmatmul.msk.bf16.vlgmr.msrb.gmra.mxu1 %vm24_vm0, %v131_v15 }
  0xfe   :  { %v63_v16 = vpop.f32.mrf.mxu1  ;;  %v129_v17 = vpop.f32.mrf.mxu0 }
 0x109   :  { %235 = vmatmul.msk.bf16.vlgmr.msrb.gmra.mxu2 %vm24_vm0, %v159_v18 }
 0x10b   :  { %v109_v19 = vpop.f32.mrf.mxu3 }
 0x113   :  { %v111_v21 = vpop.f32.mrf.mxu3 }
 0x176   :  { %v153_v22 = vpop.f32.mrf.mxu1 }
 0x17c   :  { %v87_v23 = vpop.f32.mrf.mxu2 }
 0x17d   :  { %v110_v24 = vadd.f32 %v109_v19, %v87_v23 }
 0x17e   :  { %v155_v25 = vpop.f32.mrf.mxu1 }
 0x17f   :  { %v157_v26 = vadd.f32 %v153_v22, %v110_v24 }
 0x184   :  { %v89_v27 = vpop.f32.mrf.mxu2 }
 0x18c   :  { %v172_v28 = vpop.f32.mrf.mxu2 }
 0x18d   :  { %v176_v29 = vpack.c.bf16 %v172_v28, %v172_v28 }
 0x18f   :  { %242 = vmatmul.msk.bf16.vlgmr.msrb.gmra.mxu3 %vm24_vm0, %v176_v29 }
 0x194   :  { %v174_v30 = vpop.f32.mrf.mxu2 }
 0x212   :  { %v198_v31 = vpop.f32.mrf.mxu3 }
 0x213   :  { %v202_v32 = vadd.f32 %v198_v31, %v157_v26 }
 0x215   :  { %204 = vst.msk [vmem:[%s306_s3] sm:$0xff] %vm203_vm1, %v202_v32 }
 0x21a   :  { %v200_v33 = vpop.f32.mrf.mxu3 }

</bundles_post_ra>
